<compile_context>
chip_gen: v7x
topology: tpu7x:2x2x1
jax: 0.10.0
libtpu: 0.0.40
codegen_flags: <defaults>
</compile_context>

<pallas_src>
import math

import jax
import jax.numpy as jnp
import numpy as np
from jax.experimental import pallas as pl
from jax.experimental.pallas import tpu as pltpu

_INV_SQRT2 = 0.7071067811865476


def _erf_approx(x):
    # Abramowitz & Stegun 7.1.26 rational approximation of erf
    # (max abs error ~1.5e-7); uses only exp + elementwise ops.
    a1 = 0.254829592
    a2 = -0.284496736
    a3 = 1.421413741
    a4 = -1.453152027
    a5 = 1.061405429
    p = 0.3275911
    sign = jnp.where(x >= 0.0, 1.0, -1.0)
    ax = jnp.abs(x)
    t = 1.0 / (1.0 + p * ax)
    poly = ((((a5 * t + a4) * t + a3) * t + a2) * t + a1) * t
    return sign * (1.0 - poly * jnp.exp(-ax * ax))


def _gelu_exact(x):
    # nn.GELU() default: 0.5 * x * (1 + erf(x / sqrt(2)))
    return 0.5 * x * (1.0 + _erf_approx(x * _INV_SQRT2))


def ffn_kernel(x_ref, w1t_ref, b1_ref, w2t_ref, b2_ref, o_ref):
    # x_ref: (block_rows, H); weights pre-transposed so the kernel does x @ W^T.
    x = x_ref[...]
    h = jnp.dot(x, w1t_ref[...], preferred_element_type=jnp.float32) + b1_ref[...]
    h = _gelu_exact(h)
    y = jnp.dot(h, w2t_ref[...], preferred_element_type=jnp.float32) + b2_ref[...]
    o_ref[...] = y.astype(o_ref.dtype)


def ffn_pallas(particles, w1, b1, w2, b2, *, block_rows=128):
    """particles: (..., H) f32; w1/w2: (H, H) as in nn.Linear (out, in); b1/b2: (H,)."""
    # TODO(synk): training-mode dropout (stochastic masking) not implemented;
    # forward matches the module in eval() mode where nn.Dropout is identity.
    orig_shape = particles.shape
    H = orig_shape[-1]
    x2d = particles.reshape(-1, H)
    M = x2d.shape[0]

    n_blocks = pl.cdiv(M, block_rows)
    Mp = n_blocks * block_rows
    if Mp != M:
        x2d = jnp.pad(x2d, ((0, Mp - M), (0, 0)))

    # nn.Linear computes x @ W^T + b; pass W^T so the MXU contraction is direct.
    w1t = w1.T
    w2t = w2.T
    b1r = b1.reshape(1, H)
    b2r = b2.reshape(1, H)

    row_spec = pl.BlockSpec((1, H), lambda i: (0, 0))      # resident bias
    mat_spec = pl.BlockSpec((H, H), lambda i: (0, 0))      # resident weight

    out = pl.pallas_call(
        ffn_kernel,
        out_shape=jax.ShapeDtypeStruct((Mp, H), particles.dtype),
        grid=(n_blocks,),
        in_specs=[
            pl.BlockSpec((block_rows, H), lambda i: (i, 0)),  # streamed rows
            mat_spec, row_spec,                               # linear1
            mat_spec, row_spec,                               # linear2
        ],
        out_specs=pl.BlockSpec((block_rows, H), lambda i: (i, 0)),
        compiler_params=pltpu.CompilerParams(
            dimension_semantics=("parallel",)),
    )(x2d, w1t, b1r, w2t, b2r)

    if Mp != M:
        out = out[:M]
    return out.reshape(orig_shape)


def reference_forward(particles, w1, b1, w2, b2):
    """Pure-JAX reference mirroring FFN.forward in eval mode (exact GELU)."""
    h = jnp.dot(particles, w1.T, precision=jax.lax.Precision.HIGHEST) + b1
    h = jax.nn.gelu(h, approximate=False)
    return jnp.dot(h, w2.T, precision=jax.lax.Precision.HIGHEST) + b2


if __name__ == "__main__":
    # Small, forward-consistent shapes: particles [batch, num_particles, hidden].
    B = 2
    P = 192            # number of particles (M = B*P = 384 rows -> 3 grid steps)
    H = 128            # hidden_size (lane-dense)

    key = jax.random.PRNGKey(0)
    kx, k1, k2, k3, k4 = jax.random.split(key, 5)
    scale = 1.0 / math.sqrt(H)

    particles = jax.random.normal(kx, (B, P, H), jnp.float32)
    w1 = jax.random.normal(k1, (H, H), jnp.float32) * scale
    b1 = jax.random.normal(k2, (H,), jnp.float32) * scale
    w2 = jax.random.normal(k3, (H, H), jnp.float32) * scale
    b2 = jax.random.normal(k4, (H,), jnp.float32) * scale

    out = jax.block_until_ready(ffn_pallas(particles, w1, b1, w2, b2))
    ref = jax.block_until_ready(reference_forward(particles, w1, b1, w2, b2))

    np.testing.assert_allclose(np.asarray(out), np.asarray(ref),
                               rtol=1e-4, atol=1e-4)
    print("KERNEL_OK")
</pallas_src>

<mosaic_0001>
module attributes {stable_mosaic.version = 11 : i64} {
  func.func @ffn_kernel(%arg0: i32, %arg1: memref<128x128xf32, #tpu.memory_space<vmem>>, %arg2: memref<128x128xf32, #tpu.memory_space<vmem>>, %arg3: memref<1x128xf32, #tpu.memory_space<vmem>>, %arg4: memref<128x128xf32, #tpu.memory_space<vmem>>, %arg5: memref<1x128xf32, #tpu.memory_space<vmem>>, %arg6: memref<128x128xf32, #tpu.memory_space<vmem>>) attributes {dimension_semantics = [#tpu.dimension_semantics<parallel>], iteration_bounds = array<i64: 3>, scalar_prefetch = 0 : i64, scratch_operands = 0 : i64, tpu.core_type = #tpu.core_type<tc>, window_params = [{transform_indices = @transform_0, window_bounds = array<i64: 128, 128>}, {pipeline_mode = #tpu.pipeline_mode<synchronous>, transform_indices = @transform_1, window_bounds = array<i64: 128, 128>}, {pipeline_mode = #tpu.pipeline_mode<synchronous>, transform_indices = @transform_2, window_bounds = array<i64: 1, 128>}, {pipeline_mode = #tpu.pipeline_mode<synchronous>, transform_indices = @transform_3, window_bounds = array<i64: 128, 128>}, {pipeline_mode = #tpu.pipeline_mode<synchronous>, transform_indices = @transform_4, window_bounds = array<i64: 1, 128>}, {transform_indices = @transform_5, window_bounds = array<i64: 128, 128>}]} {
    %c0 = arith.constant 0 : index
    %c0_0 = arith.constant 0 : index
    %0 = vector.load %arg1[%c0, %c0_0] : memref<128x128xf32, #tpu.memory_space<vmem>>, vector<128x128xf32>
    %c0_1 = arith.constant 0 : index
    %c0_2 = arith.constant 0 : index
    %1 = vector.load %arg2[%c0_1, %c0_2] : memref<128x128xf32, #tpu.memory_space<vmem>>, vector<128x128xf32>
    %cst = arith.constant dense<0.000000e+00> : vector<128x128xf32>
    %2 = tpu.matmul %0, %1, %cst {dimension_numbers = #tpu.dot_dimension_numbers<[1], [0], [0], [1], [0, 0, 1, 1], [], []>} : vector<128x128xf32>, vector<128x128xf32>, vector<128x128xf32> -> vector<128x128xf32>
    %c0_3 = arith.constant 0 : index
    %c0_4 = arith.constant 0 : index
    %3 = vector.load %arg3[%c0_3, %c0_4] : memref<1x128xf32, #tpu.memory_space<vmem>>, vector<1x128xf32>
    %4 = vector.broadcast %3 : vector<1x128xf32> to vector<128x128xf32>
    %5 = arith.addf %2, %4 : vector<128x128xf32>
    %cst_5 = arith.constant 5.000000e-01 : f32
    %6 = vector.broadcast %cst_5 : f32 to vector<128x128xf32>
    %7 = arith.mulf %6, %5 : vector<128x128xf32>
    %cst_6 = arith.constant 0.707106769 : f32
    %8 = vector.broadcast %cst_6 : f32 to vector<128x128xf32>
    %9 = arith.mulf %5, %8 : vector<128x128xf32>
    %cst_7 = arith.constant 0.000000e+00 : f32
    %10 = vector.broadcast %cst_7 : f32 to vector<128x128xf32>
    %11 = arith.cmpf oge, %9, %10 : vector<128x128xf32>
    %cst_8 = arith.constant 1.000000e+00 : f32
    %cst_9 = arith.constant -1.000000e+00 : f32
    %12 = vector.broadcast %cst_8 : f32 to vector<128x128xf32>
    %13 = vector.broadcast %cst_9 : f32 to vector<128x128xf32>
    %14 = arith.select %11, %12, %13 : vector<128x128xi1>, vector<128x128xf32>
    %15 = math.absf %9 : vector<128x128xf32>
    %cst_10 = arith.constant 0.327591091 : f32
    %16 = vector.broadcast %cst_10 : f32 to vector<128x128xf32>
    %17 = arith.mulf %16, %15 : vector<128x128xf32>
    %cst_11 = arith.constant 1.000000e+00 : f32
    %18 = vector.broadcast %cst_11 : f32 to vector<128x128xf32>
    %19 = arith.addf %18, %17 : vector<128x128xf32>
    %cst_12 = arith.constant 1.000000e+00 : f32
    %20 = vector.broadcast %cst_12 : f32 to vector<128x128xf32>
    %21 = arith.divf %20, %19 : vector<128x128xf32>
    %cst_13 = arith.constant 1.06140542 : f32
    %22 = vector.broadcast %cst_13 : f32 to vector<128x128xf32>
    %23 = arith.mulf %22, %21 : vector<128x128xf32>
    %cst_14 = arith.constant -1.45315206 : f32
    %24 = vector.broadcast %cst_14 : f32 to vector<128x128xf32>
    %25 = arith.addf %23, %24 : vector<128x128xf32>
    %26 = arith.mulf %25, %21 : vector<128x128xf32>
    %cst_15 = arith.constant 1.42141378 : f32
    %27 = vector.broadcast %cst_15 : f32 to vector<128x128xf32>
    %28 = arith.addf %26, %27 : vector<128x128xf32>
    %29 = arith.mulf %28, %21 : vector<128x128xf32>
    %cst_16 = arith.constant -0.284496725 : f32
    %30 = vector.broadcast %cst_16 : f32 to vector<128x128xf32>
    %31 = arith.addf %29, %30 : vector<128x128xf32>
    %32 = arith.mulf %31, %21 : vector<128x128xf32>
    %cst_17 = arith.constant 0.254829586 : f32
    %33 = vector.broadcast %cst_17 : f32 to vector<128x128xf32>
    %34 = arith.addf %32, %33 : vector<128x128xf32>
    %35 = arith.mulf %34, %21 : vector<128x128xf32>
    %cst_18 = arith.constant 0.000000e+00 : f32
    %36 = vector.broadcast %cst_18 : f32 to vector<128x128xf32>
    %37 = arith.subf %36, %15 : vector<128x128xf32>
    %38 = arith.mulf %37, %15 : vector<128x128xf32>
    %39 = math.exp %38 : vector<128x128xf32>
    %40 = arith.mulf %35, %39 : vector<128x128xf32>
    %cst_19 = arith.constant 1.000000e+00 : f32
    %41 = vector.broadcast %cst_19 : f32 to vector<128x128xf32>
    %42 = arith.subf %41, %40 : vector<128x128xf32>
    %43 = arith.mulf %14, %42 : vector<128x128xf32>
    %cst_20 = arith.constant 1.000000e+00 : f32
    %44 = vector.broadcast %cst_20 : f32 to vector<128x128xf32>
    %45 = arith.addf %44, %43 : vector<128x128xf32>
    %46 = arith.mulf %7, %45 : vector<128x128xf32>
    %c0_21 = arith.constant 0 : index
    %c0_22 = arith.constant 0 : index
    %47 = vector.load %arg4[%c0_21, %c0_22] : memref<128x128xf32, #tpu.memory_space<vmem>>, vector<128x128xf32>
    %cst_23 = arith.constant dense<0.000000e+00> : vector<128x128xf32>
    %48 = tpu.matmul %46, %47, %cst_23 {dimension_numbers = #tpu.dot_dimension_numbers<[1], [0], [0], [1], [0, 0, 1, 1], [], []>} : vector<128x128xf32>, vector<128x128xf32>, vector<128x128xf32> -> vector<128x128xf32>
    %c0_24 = arith.constant 0 : index
    %c0_25 = arith.constant 0 : index
    %49 = vector.load %arg5[%c0_24, %c0_25] : memref<1x128xf32, #tpu.memory_space<vmem>>, vector<1x128xf32>
    %50 = vector.broadcast %49 : vector<1x128xf32> to vector<128x128xf32>
    %51 = arith.addf %48, %50 : vector<128x128xf32>
    %c0_26 = arith.constant 0 : index
    %c0_27 = arith.constant 0 : index
    %52 = vector.load %arg6[%c0_26, %c0_27] : memref<128x128xf32, #tpu.memory_space<vmem>>, vector<128x128xf32>
    tpu.vector_store %arg6[%c0_26, %c0_27], %51 {strides = array<i32>} : memref<128x128xf32, #tpu.memory_space<vmem>>, vector<128x128xf32>,
    return
  }
  func.func @transform_0(%arg0: i32) -> (i32, i32) {
    %c0_i32 = arith.constant 0 : i32
    %c0_i32_0 = arith.constant 0 : i32
    return %arg0, %c0_i32 : i32, i32
  }
  func.func @transform_1(%arg0: i32) -> (i32, i32) {
    %c0_i32 = arith.constant 0 : i32
    %c0_i32_0 = arith.constant 0 : i32
    %c0_i32_1 = arith.constant 0 : i32
    return %c0_i32, %c0_i32_0 : i32, i32
  }
  func.func @transform_2(%arg0: i32) -> (i32, i32) {
    %c0_i32 = arith.constant 0 : i32
    %c0_i32_0 = arith.constant 0 : i32
    %c0_i32_1 = arith.constant 0 : i32
    return %c0_i32, %c0_i32_0 : i32, i32
  }
  func.func @transform_3(%arg0: i32) -> (i32, i32) {
    %c0_i32 = arith.constant 0 : i32
    %c0_i32_0 = arith.constant 0 : i32
    %c0_i32_1 = arith.constant 0 : i32
    return %c0_i32, %c0_i32_0 : i32, i32
  }
  func.func @transform_4(%arg0: i32) -> (i32, i32) {
    %c0_i32 = arith.constant 0 : i32
    %c0_i32_0 = arith.constant 0 : i32
    %c0_i32_1 = arith.constant 0 : i32
    return %c0_i32, %c0_i32_0 : i32, i32
  }
  func.func @transform_5(%arg0: i32) -> (i32, i32) {
    %c0_i32 = arith.constant 0 : i32
    %c0_i32_0 = arith.constant 0 : i32
    return %arg0, %c0_i32 : i32, i32
  }
}

</mosaic_0001>

<bundles_post_ra>
// kernel: tpu_custom_call.1
= control target key start
LH: loop header
LB: loop body
LE: loop exit
PB: predicated region body
PF: predicated region fallthrough
CT: control target
= control target key end

     0   :  { %10 = vsyncpa [#allocation3], 0  ;;  %s2380_s0 = inlined_call_operand.hbm [shape: f32[384,128], index: 0, kind: input, shape index: {}]   ;;  %s2381_s1 = inlined_call_operand.hbm [shape: f32[128,128], index: 1, kind: input, shape index: {}]   ;;  %s2382_s2 = inlined_call_operand.vmem [shape: f32[1,128], index: 2, kind: input, shape index: {}]   ;;  %s2383_s3 = inlined_call_operand.hbm [shape: f32[128,128], index: 3, kind: input, shape index: {}]   ;;  %s2384_s4 = inlined_call_operand.vmem [shape: f32[1,128], index: 4, kind: input, shape index: {}]   ;;  %s2385_s5 = inlined_call_operand.hbm [shape: f32[384,128], index: 5, kind: output, shape index: {}]  }
   0x1   :  { %12 = vsyncpa [#allocation3 + $0x1], 0 }
   0x2   :  { %13 = vsyncpa [#allocation6], 0 }
   0x3   :  { %14 = vsyncpa [#allocation4], 0 }
   0x4   :  { %16 = vsyncpa [#allocation4 + $0x1], 0  ;;  %s1775_s18 = smov 0   ;;  %s1777_s19 = smov 0  }
   0x5   :  { %s1779_s20 = smov 0   ;;  %s1781_s21 = smov 0  }
   0x6 LB: > { %s1796_s22 = sadd.s32 4294967295, %s1734_s21   ;;  %s1180_s23 = sadd.s32 4294967294, %s1734_s21   ;;  %s1734_s21 = sphi %s1781_s21, %s2456_s21   ;;  %s1730_s20 = sphi %s1779_s20, %s2455_s20   ;;  %s1726_s19 = sphi %s1777_s19, %s2454_s19   ;;  %s1722_s18 = sphi %s1775_s18, %s2453_s18  }
   0x7   : > { %p42_p0 = scmp.ne.s32.totalorder %s1726_s19, %s1722_s18  ;;  %p2386_p1 = scmp.eq.s32.totalorder %s1796_s22, 0 }
   0x8   : > { %p156_p3 = scmp.eq.s32.totalorder %s1180_s23, 2  ;;  %p1181_p5 = scmp.ge.s32.totalorder %s1734_s21, 1 }
   0x9   : > { %p1805_p4 = por %p2386_p1, %p42_p0  ;;  %p163_p7 = scmp.lt.s32.totalorder %s1734_s21, 4 }
   0xa   : > { %p1810_p6 = por %p156_p3, %p42_p0  ;;  %s1736_s27 = smov [#allocation5]  }
   0xb   : > { %s2397_s24 = scalar_select %p1805_p4, 1, 0 }
   0xc   : > { %s2398_s25 = scalar_select %p1810_p6, 1, 0 }
   0xd   : > { %p1815_p8 = pnand %p1181_p5, %p163_p7  ;;  %s175_s28 = sshll.u32 %s1736_s27, 4  ;;  %s176_s28 = int_to_ptr.vmem [resolvable:$true] %s175_s28 }
   0xe   : > { %s1737_s30 = smov [#allocation7]   ;;  %s1578_s9 = scalar_lea.hbm %s2381_s1, 2048 }
   0xf   : > { %s2399_s26 = scalar_select %p1815_p8, 1, 0 }
  0x10   : > { %p1454_p9 = pneg %p1815_p8  ;;  %s191_s6 = sshll.u32 %s1737_s30, 4  ;;  %s1827_s6 = int_to_ptr.vmem [resolvable:$true] %s191_s6 }
  0x11   : > { %p1579_p11 = scmp.ne.s32.totalorder %s2381_s1, %s1578_s9  ;;  %p1585_p3 = scmp.lt.u32.totalorder %s1578_s9, %s2381_s1 }
  0x12   : > { %p1823_p10 = pnand %p1454_p9, %p2386_p1 }
  0x14   : > { %p1580_p12 = pneg %p1823_p10 }
  0x16   : > { %p1581_p13 = pnand %p1580_p12, %p1579_p11 }
  0x18   : > { %p1582_p0 = pneg %p1581_p13 }
  0x1a   : > { %p1587_p5 = pnand %p1585_p3, %p1582_p0 }
  0x1c   : > { %1590 = shalt.err (!%p1587_p5)
}
  0x1d   : > { %s1591_s14 = scalar_lea.vmem %s176_s28, 2048  ;;  %p1599_p2 = scmp.lt.s32.totalorder %s176_s28, %s176_s28 }
  0x1e   : > { %p1592_p7 = scmp.ne.s32.totalorder %s176_s28, %s1591_s14  ;;  %p1600_p6 = scmp.lt.s32.totalorder %s1591_s14, %s1591_s14 }
  0x20   : > { %p1594_p9 = pnand %p1592_p7, %p1580_p12  ;;  %p1601_p4 = por %p1600_p6, %p1599_p2 }
  0x22   : > { %p1595_p1 = pneg %p1594_p9 }
  0x24   : > { %p1602_p8 = pnand %p1601_p4, %p1595_p1 }
  0x26   : > { %1605 = shalt.err (!%p1602_p8)
}
  0x27   : > { %s1738_s15 = smov 128   ;;  %s1739_s16 = smov 8  }
  0x28   : > { %1457 = dma.hbm_to_vmem [thread:$0]  (!%p1823_p10), %s2381_s1, 2048, %s176_s28, [#allocation6], %s1738_s15, %s1738_s15, %s1739_s16  }
  0x29   : > { %s1606_s7 = scalar_lea.hbm %s2383_s3, 2048 }
  0x2a   : > { %p1607_p1 = scmp.ne.s32.totalorder %s2383_s3, %s1606_s7  ;;  %p1613_p6 = scmp.lt.u32.totalorder %s1606_s7, %s2383_s3 }
  0x2c   : > { %p1609_p2 = pnand %p1607_p1, %p1580_p12 }
  0x2e   : > { %p1610_p4 = pneg %p1609_p2 }
  0x30   : > { %p1615_p8 = pnand %p1613_p6, %p1610_p4 }
  0x32   : > { %1618 = shalt.err (!%p1615_p8)
}
  0x33   : > { %s1619_s28 = scalar_lea.vmem %s1827_s6, 2048  ;;  %p1627_p3 = scmp.lt.s32.totalorder %s1827_s6, %s1827_s6 }
  0x34   : > { %p1620_p11 = scmp.ne.s32.totalorder %s1827_s6, %s1619_s28  ;;  %p1628_p5 = scmp.lt.s32.totalorder %s1619_s28, %s1619_s28 }
  0x36   : > { %p1622_p13 = pnand %p1620_p11, %p1580_p12  ;;  %p1629_p7 = por %p1628_p5, %p1627_p3 }
  0x38   : > { %p1623_p0 = pneg %p1622_p13 }
  0x3a   : > { %p1630_p9 = pnand %p1629_p7, %p1623_p0 }
  0x3c   : > { %1633 = shalt.err (!%p1630_p9)
}
  0x3d   : > { %1460 = dma.hbm_to_vmem [thread:$0]  (!%p1823_p10), %s2383_s3, 2048, %s1827_s6, [#allocation6], %s1738_s15, %s1738_s15, %s1739_s16  }
  0x3e   : > { %s1883_s29 = sadd.s32 1, %s1734_s21   ;;  %s29_s14 = sadd.s32 1, %s1730_s20 }
  0x3f   : > { %s26_s17 = ssub.s32 %s1734_s21, %s1883_s29  ;;  %p36_p12 = scmp.ne.s32.totalorder %s1730_s20, %s1726_s19 }
  0x40   : > { %p27_p1 = scmp.eq.s32.totalorder %s26_s17, 0  ;;  %p37_p2 = scmp.eq.s32.totalorder %s1734_s21, 0 }
  0x41   : > { %p2401_p4 = scmp.eq.s32.totalorder %s1796_s22, 2  ;;  %p1471_p8 = scmp.lt.s32.totalorder %s1734_s21, 3 }
  0x42   : > { %s1899_s27 = scalar_select %p27_p1, %s1730_s20, %s29_s14  }
  0x43   : > { %p1893_p6 = por %p2401_p4, %p36_p12  ;;  %p38_p11 = por %p37_p2, %p36_p12 }
  0x44   : > { %s208_s30 = sand.u32 1, %s1730_s20   ;;  %s1200_s6 = sshll.u32 %s1734_s21, 11 }
  0x45   : > { %s1185_s7 = sshll.u32 %s208_s30, 7  ;;  %s1906_s10 = scalar_lea.hbm %s2380_s0, %s1200_s6 }
  0x46   : > { %s212_s11 = scalar_lea.vmem [#allocation2], %s1185_s7  ;;  %p1910_p10 = pnand %p1471_p8, %p38_p11 }
  0x47   : > { %s219_s28 = sshll.u32 %s212_s11, 4  ;;  %s1914_s13 = scalar_lea.sflag [#allocation3], %s208_s30  ;;  %s1908_s28 = int_to_ptr.vmem [resolvable:$true] %s219_s28 }
  0x48   : > { %s1634_s14 = scalar_lea.hbm %s1906_s10, 2048  ;;  %p1636_p0 = pneg %p1910_p10 }
  0x49   : > { %p1635_p13 = scmp.ne.s32.totalorder %s1906_s10, %s1634_s14  ;;  %s1639_s6 = scalar_lea.hbm %s2380_s0, 6144 }
  0x4a   : > { %p1640_p7 = scmp.lt.u32.totalorder %s1906_s10, %s2380_s0  ;;  %p1641_p9 = scmp.lt.u32.totalorder %s1639_s6, %s1634_s14 }
  0x4b   : > { %p1637_p3 = pnand %p1636_p0, %p1635_p13  ;;  %p1643_p1 = scmp.lt.u32.totalorder %s1634_s14, %s1906_s10 }
  0x4c   : > { %p1642_p12 = por %p1641_p9, %p1640_p7 }
  0x4d   : > { %p1638_p5 = pneg %p1637_p3 }
  0x4e   : > { %p1644_p2 = por %p1643_p1, %p1642_p12 }
  0x50   : > { %p1645_p4 = pnand %p1644_p2, %p1638_p5 }
  0x52   : > { %1648 = shalt.err (!%p1645_p4)
}
  0x53   : > { %s1649_s30 = scalar_lea.vmem %s1908_s28, 2048  ;;  %s1740_s11 = smov [#allocation2]  }
  0x54   : > { %p1650_p8 = scmp.ne.s32.totalorder %s1908_s28, %s1649_s30  ;;  %s1654_s17 = sshll.u32 %s1740_s11, 4  ;;  %s1655_s17 = int_to_ptr.vmem [resolvable:$false] %s1654_s17 }
  0x55   : > { %s1656_s7 = scalar_lea.vmem %s1655_s17, 4096  ;;  %p1657_p3 = scmp.lt.s32.totalorder %s1908_s28, %s1655_s17 }
  0x56   : > { %p1652_p11 = pnand %p1650_p8, %p1636_p0  ;;  %p1658_p7 = scmp.lt.s32.totalorder %s1656_s7, %s1649_s30 }
  0x58   : > { %p1653_p13 = pneg %p1652_p11  ;;  %p1659_p9 = por %p1658_p7, %p1657_p3 }
  0x5a   : > { %p1660_p12 = pnand %p1659_p9, %p1653_p13 }
  0x5c   : > { %1663 = shalt.err (!%p1660_p12)
}
  0x5d   : > { %1464 = dma.hbm_to_vmem [thread:$0]  (!%p1910_p10), %s1906_s10, 2048, %s1908_s28, %s1914_s13, %s1738_s15, %s1738_s15, %s1739_s16  }
  0x5e   : > { %p2404_p0 = scmp.ne.s32.totalorder %s2399_s26, 0 }
  0x60   : > { %231 = sbr.rel (%p2404_p0) target bundleno = 707 (0x2c3), region = 40 }
  0x67   : > { %s1948_s14 = sand.u32 1, %s1726_s19   ;;  %p2405_p5 = scmp.ne.s32.totalorder %s2397_s24, 0 }
  0x68   : > { %s1189_s6 = sshll.u32 %s1948_s14, 7  ;;  %s234_s8 = scalar_lea.sflag [#allocation3], %s1948_s14 }
  0x69   : > { %s1954_s12 = scalar_lea.vmem [#allocation2], %s1189_s6 }
  0x6a   : > { %1709 = dma.done.wait (%p2405_p5), %s234_s8, 2048  }
  0x6b   : > { %1711 = vsyncadd (%p2405_p5), %s234_s8, 4294965248  ;;  %p2406_p10 = scmp.eq.s32.totalorder %s1796_s22, 0 }
  0x6d   : > { %1713 = dma.done.wait (%p2406_p10), [#allocation6], 4096   ;;  %p2407_p1 = pmov %p2406_p10 }
  0x6e   : > { %v290_v0 = vld [vmem:[#allocation5] sm:$0xff]  ;;  %v291_v1 = vld [vmem:[#allocation5 + $0x8] sm:$0xff]  ;;  %v292_v2 = vld [vmem:[#allocation5 + $0x10] sm:$0xff]  ;;  %s2312_s10 = scalar_lea.vmem [#allocation8], %s1189_s6  ;;  %s1201_s28 = sshll.u32 %s1796_s22, 11 }
  0x6f   : > { %1715 = vsyncadd (%p2407_p1), [#allocation6], 4294963200  ;;  %v1378_v3 = vpack.c.bf16 %v291_v1, %v290_v0  ;;  %v293_v4 = vld [vmem:[#allocation5 + $0x18] sm:$0xff]  ;;  %v294_v6 = vld [vmem:[#allocation5 + $0x20] sm:$0xff]  ;;  %s1088_s13 = sshll.u32 %s2312_s10, 4  ;;  %s2333_s11 = scalar_lea.hbm %s2385_s5, %s1201_s28  ;;  %s2335_s13 = int_to_ptr.vmem [resolvable:$true] %s1088_s13 }
  0x70   : > { %v1382_v5 = vpack.c.bf16 %v293_v4, %v292_v2  ;;  %v295_v7 = vld [vmem:[#allocation5 + $0x28] sm:$0xff]  ;;  %v274_v9 = vld [vmem:[%s1954_s12] sm:$0xff]  ;;  %v296_v10 = vld [vmem:[#allocation5 + $0x30] sm:$0xff]  ;;  %s1075_s22 = scalar_lea.sflag [#allocation4], %s1948_s14  ;;  %s1664_s17 = scalar_lea.vmem %s2335_s13, 2048 }
  0x71   : > { %1379 = vmatprep.subr.bf16.mxu0 %v1378_v3  ;;  %v1386_v8 = vpack.c.bf16 %v295_v7, %v294_v6  ;;  %v297_v11 = vld [vmem:[#allocation5 + $0x38] sm:$0xff]  ;;  %1298 = vmatprep.mubr.f32.mxu0 %v274_v9  ;;  %v298_v13 = vld [vmem:[#allocation5 + $0x40] sm:$0xff]  ;;  %v299_v14 = vld [vmem:[#allocation5 + $0x48] sm:$0xff]  ;;  %p1665_p2 = scmp.ne.s32.totalorder %s2335_s13, %s1664_s17  ;;  %s1742_s7 = smov [#allocation8]  }
  0x72   : > { %1381 = vmatpush3.bf16.msra.mxu0 %v1378_v3  ;;  %v1390_v12 = vpack.c.bf16 %v297_v11, %v296_v10  ;;  %v1394_v15 = vpack.c.bf16 %v299_v14, %v298_v13  ;;  %v300_v16 = vld [vmem:[#allocation5 + $0x50] sm:$0xff]  ;;  %v301_v17 = vld [vmem:[#allocation5 + $0x58] sm:$0xff]  ;;  %v302_v19 = vld [vmem:[#allocation5 + $0x60] sm:$0xff]  ;;  %s1668_s6 = sshll.u32 %s1742_s7, 4  ;;  %s1669_s6 = int_to_ptr.vmem [resolvable:$false] %s1668_s6 }
  0x73   : > { %1383 = vmatprep.subr.bf16.mxu0 %v1382_v5  ;;  %v1398_v18 = vpack.c.bf16 %v301_v17, %v300_v16  ;;  %v303_v20 = vld [vmem:[#allocation5 + $0x68] sm:$0xff]  ;;  %v304_v22 = vld [vmem:[#allocation5 + $0x70] sm:$0xff]  ;;  %v305_v23 = vld [vmem:[#allocation5 + $0x78] sm:$0xff]  ;;  %p1666_p4 = pnand %p1665_p2, %p1893_p6  ;;  %s1670_s8 = scalar_lea.vmem %s1669_s6, 4096 }
  0x74   : > { %v1402_v21 = vpack.c.bf16 %v303_v20, %v302_v19  ;;  %v1406_v24 = vpack.c.bf16 %v305_v23, %v304_v22  ;;  %v275_v25 = vld [vmem:[%s1954_s12 + $0x8] sm:$0xff]  ;;  %v276_v26 = vld [vmem:[%s1954_s12 + $0x10] sm:$0xff]  ;;  %v277_v27 = vld [vmem:[%s1954_s12 + $0x18] sm:$0xff]  ;;  %p1671_p11 = scmp.lt.s32.totalorder %s2335_s13, %s1669_s6  ;;  %p1672_p13 = scmp.lt.s32.totalorder %s1670_s8, %s1664_s17 }
  0x75   : > { %v278_v28 = vld [vmem:[%s1954_s12 + $0x20] sm:$0xff]  ;;  %v279_v29 = vld [vmem:[%s1954_s12 + $0x28] sm:$0xff]  ;;  %v280_v30 = vld [vmem:[%s1954_s12 + $0x30] sm:$0xff]  ;;  %p1667_p8 = pneg %p1666_p4 }
  0x76   : > { %1385 = vmatpush3.bf16.msra.mxu0 %v1382_v5  ;;  %v281_v31 = vld [vmem:[%s1954_s12 + $0x38] sm:$0xff]  ;;  %v282_v32 = vld [vmem:[%s1954_s12 + $0x40] sm:$0xff]  ;;  %v283_v33 = vld [vmem:[%s1954_s12 + $0x48] sm:$0xff]  ;;  %p1673_p3 = por %p1672_p13, %p1671_p11 }
  0x77   : > { %1387 = vmatprep.subr.bf16.mxu0 %v1386_v8  ;;  %v284_v34 = vld [vmem:[%s1954_s12 + $0x50] sm:$0xff]  ;;  %v285_v35 = vld [vmem:[%s1954_s12 + $0x58] sm:$0xff]  ;;  %v286_v36 = vld [vmem:[%s1954_s12 + $0x60] sm:$0xff] }
  0x78   : > { %v287_v37 = vld [vmem:[%s1954_s12 + $0x68] sm:$0xff]  ;;  %v288_v38 = vld [vmem:[%s1954_s12 + $0x70] sm:$0xff]  ;;  %v289_v39 = vld [vmem:[%s1954_s12 + $0x78] sm:$0xff]  ;;  %p1674_p7 = pnand %p1673_p3, %p1667_p8 }
  0x79   : > { %v890_v40 = vld [vmem:[#allocation7] sm:$0xff]  ;;  %v891_v41 = vld [vmem:[#allocation7 + $0x8] sm:$0xff]  ;;  %v892_v43 = vld [vmem:[#allocation7 + $0x10] sm:$0xff] }
  0x7a   : > { %1389 = vmatpush3.bf16.msra.mxu0 %v1386_v8  ;;  %v1410_v42 = vpack.c.bf16 %v891_v41, %v890_v40  ;;  %v893_v44 = vld [vmem:[#allocation7 + $0x18] sm:$0xff]  ;;  %v894_v46 = vld [vmem:[#allocation7 + $0x20] sm:$0xff]  ;;  %v895_v47 = vld [vmem:[#allocation7 + $0x28] sm:$0xff] }
  0x7b   : > { %1391 = vmatprep.subr.bf16.mxu0 %v1390_v12  ;;  %v1414_v45 = vpack.c.bf16 %v893_v44, %v892_v43  ;;  %v1418_v48 = vpack.c.bf16 %v895_v47, %v894_v46  ;;  %v896_v49 = vld [vmem:[#allocation7 + $0x30] sm:$0xff]  ;;  %v897_v50 = vld [vmem:[#allocation7 + $0x38] sm:$0xff]  ;;  %v898_v52 = vld [vmem:[#allocation7 + $0x40] sm:$0xff] }
  0x7c   : > { %1411 = vmatprep.subr.bf16.mxu1 %v1410_v42  ;;  %v1422_v51 = vpack.c.bf16 %v897_v50, %v896_v49  ;;  %v899_v53 = vld [vmem:[#allocation7 + $0x48] sm:$0xff]  ;;  %v900_v55 = vld [vmem:[#allocation7 + $0x50] sm:$0xff]  ;;  %v901_v56 = vld [vmem:[#allocation7 + $0x58] sm:$0xff] }
  0x7d   : > { %1413 = vmatpush3.bf16.msra.mxu1 %v1410_v42  ;;  %v1426_v54 = vpack.c.bf16 %v899_v53, %v898_v52  ;;  %v1430_v57 = vpack.c.bf16 %v901_v56, %v900_v55  ;;  %v902_v58 = vld [vmem:[#allocation7 + $0x60] sm:$0xff]  ;;  %v903_v59 = vld [vmem:[#allocation7 + $0x68] sm:$0xff]  ;;  %v904_v61 = vld [vmem:[#allocation7 + $0x70] sm:$0xff] }
  0x7e   : > { %1393 = vmatpush3.bf16.msra.mxu0 %v1390_v12  ;;  %1415 = vmatprep.subr.bf16.mxu1 %v1414_v45  ;;  %v1434_v60 = vpack.c.bf16 %v903_v59, %v902_v58  ;;  %v905_v62 = vld [vmem:[#allocation7 + $0x78] sm:$0xff]  ;;  %v1983_v0 = vld [vmem:[%s2382_s2] ss:$0 sm:$0xff] }
  0x7f   : > { %1395 = vmatprep.subr.bf16.mxu0 %v1394_v15  ;;  %v1438_v63 = vpack.c.bf16 %v905_v62, %v904_v61 }
  0x81   : > { %1417 = vmatpush3.bf16.msra.mxu1 %v1414_v45 }
  0x82   : > { %1397 = vmatpush3.bf16.msra.mxu0 %v1394_v15  ;;  %1419 = vmatprep.subr.bf16.mxu1 %v1418_v48 }
  0x83   : > { %1399 = vmatprep.subr.bf16.mxu0 %v1398_v18 }
  0x85   : > { %1421 = vmatpush3.bf16.msra.mxu1 %v1418_v48 }
  0x86   : > { %1401 = vmatpush3.bf16.msra.mxu0 %v1398_v18  ;;  %1423 = vmatprep.subr.bf16.mxu1 %v1422_v51 }
  0x87   : > { %1403 = vmatprep.subr.bf16.mxu0 %v1402_v21 }
  0x89   : > { %1425 = vmatpush3.bf16.msra.mxu1 %v1422_v51 }
  0x8a   : > { %1405 = vmatpush3.bf16.msra.mxu0 %v1402_v21  ;;  %1427 = vmatprep.subr.bf16.mxu1 %v1426_v54 }
  0x8b   : > { %1407 = vmatprep.subr.bf16.mxu0 %v1406_v24 }
  0x8d   : > { %1429 = vmatpush3.bf16.msra.mxu1 %v1426_v54 }
  0x8e   : > { %1409 = vmatpush3.bf16.msra.mxu0 %v1406_v24  ;;  %1431 = vmatprep.subr.bf16.mxu1 %v1430_v57  ;;  %v2389_v24 = vmov -1.0  }
  0x91   : > { %1299 = vmatmul.mubr.f32.vlgmr.msra.gmra.mrb[0].mxu0 %v275_v25  ;;  %1433 = vmatpush3.bf16.msra.mxu1 %v1430_v57 }
  0x92   : > { %1301 = vmatprep.mubr.f32.mxu0 %v276_v26  ;;  %1435 = vmatprep.subr.bf16.mxu1 %v1434_v60 }
  0x95   : > { %1302 = vmatmul.mubr.f32.gmra.mrb[2].mxu0 %v277_v27  ;;  %1437 = vmatpush3.bf16.msra.mxu1 %v1434_v60 }
  0x96   : > { %1304 = vmatprep.mubr.f32.mxu0 %v278_v28  ;;  %1439 = vmatprep.subr.bf16.mxu1 %v1438_v63 }
  0x99   : > { %1305 = vmatmul.mubr.f32.gmra.mrb[4].mxu0 %v279_v29  ;;  %1441 = vmatpush3.bf16.msra.mxu1 %v1438_v63 }
  0x9a   : > { %1307 = vmatprep.mubr.f32.mxu0 %v280_v30 }
  0x9d   : > { %1308 = vmatmul.mubr.f32.gmra.mrb[6].mxu0 %v281_v31 }
  0x9e   : > { %1310 = vmatprep.mubr.f32.mxu0 %v282_v32 }
  0xa1   : > { %1311 = vmatmul.mubr.f32.gmra.mrb[8].mxu0 %v283_v33 }
  0xa2   : > { %1313 = vmatprep.mubr.f32.mxu0 %v284_v34 }
  0xa5   : > { %1314 = vmatmul.mubr.f32.gmra.mrb[10].mxu0 %v285_v35 }
  0xa6   : > { %1316 = vmatprep.mubr.f32.mxu0 %v286_v36 }
  0xa9   : > { %1317 = vmatmul.mubr.f32.gmra.mrb[12].mxu0 %v287_v37 }
  0xaa   : > { %1319 = vmatprep.mubr.f32.mxu0 %v288_v38 }
  0xad   : > { %1320 = vmatmul.mubr.f32.gmra.mrb[14].mxu0 %v289_v39 }
 0x164   : > { %v1300_v1 = vpop.f32.mrb[0].mxu0 }
 0x165   : > { %v385_v2 = vadd.f32 %v1300_v1, %v1983_v0  ;;  %v379_v3 = vpop.f32.mrb[1].mxu0 }
 0x166   : > { %v380_v4 = vadd.f32 %v1983_v0, %v379_v3 }
 0x167   : > { %v475_v5 = vmul.f32 0.70710677, %v385_v2  ;;  %v1992_v23 = vmul.f32 0.5, %v385_v2 }
 0x168   : > { %v1987_v6 = vmul.f32 0.70710677, %v380_v4  ;;  %v1303_v7 = vpop.f32.mrb[2].mxu0  ;;  %v1997_v28 = vmul.f32 0.5, %v380_v4 }
 0x169   : > { %v523_v8 = vand.u32 2147483647, %v475_v5  ;;  %v395_v9 = vadd.f32 %v1303_v7, %v1983_v0  ;;  %v389_v10 = vpop.f32.mrb[3].mxu0  ;;  %vm491_vm0 = vcmp.ge.f32.partialorder %v475_v5, 0.0 }
 0x16a   : > { %v522_v11 = vand.u32 2147483647, %v1987_v6  ;;  %v390_v12 = vadd.f32 %v1983_v0, %v389_v10  ;;  %v1995_v25 = vsel %vm491_vm0, 1.0, %v2389_v24  ;;  %vm490_vm10 = vcmp.ge.f32.partialorder %v1987_v6, 0.0 }
 0x16b   : > { %v539_v13 = vmul.f32 0.3275911, %v523_v8  ;;  %v747_v14 = vsub.f32 0.0, %v523_v8  ;;  %v477_v15 = vmul.f32 0.70710677, %v395_v9  ;;  %v2001_v43 = vmul.f32 0.5, %v395_v9 }
 0x16c   : > { %v538_v16 = vmul.f32 0.3275911, %v522_v11  ;;  %v746_v17 = vsub.f32 0.0, %v522_v11  ;;  %v476_v18 = vmul.f32 0.70710677, %v390_v12  ;;  %v1306_v22 = vpop.f32.mrb[4].mxu0 }
 0x16d   : > { %v555_v19 = vadd.f32 1.0, %v539_v13  ;;  %v763_v20 = vmul.f32 %v747_v14, %v523_v8  ;;  %v525_v21 = vand.u32 2147483647, %v477_v15  ;;  %v399_v27 = vpop.f32.mrb[5].mxu0  ;;  %vm493_vm1 = vcmp.ge.f32.partialorder %v477_v15, 0.0 }
 0x16e   : > { %v762_v26 = vmul.f32 %v746_v17, %v522_v11  ;;  %v554_v29 = vadd.f32 1.0, %v538_v16  ;;  %vm492_vm2 = vcmp.ge.f32.partialorder %v476_v18, 0.0  ;;  %v524_v33 = vand.u32 2147483647, %v476_v18 }
 0x16f   : > { %v541_v30 = vmul.f32 0.3275911, %v525_v21  ;;  %v749_v31 = vsub.f32 0.0, %v525_v21  ;;  %v780_v32 = vmul.f32 1.442695, %v763_v20  ;;  %1514 = vrcp.f32 %v555_v19 }
 0x170   : > { %v1309_v34 = vpop.f32.mrb[6].mxu0  ;;  %v778_v35 = vmul.f32 1.442695, %v762_v26  ;;  %v405_v37 = vadd.f32 %v1306_v22, %v1983_v0  ;;  %v540_v40 = vmul.f32 0.3275911, %v524_v33  ;;  %v748_v41 = vsub.f32 0.0, %v524_v33 }
 0x171   : > { %v557_v36 = vadd.f32 1.0, %v541_v30  ;;  %v409_v38 = vpop.f32.mrb[7].mxu0  ;;  %v765_v39 = vmul.f32 %v749_v31, %v525_v21  ;;  %v400_v42 = vadd.f32 %v1983_v0, %v399_v27  ;;  %1516 = vrcp.f32 %v554_v29 }
 0x172   : > { %v2003_v44 = vmul.f32 0.5, %v390_v12  ;;  %v479_v45 = vmul.f32 0.70710677, %v405_v37  ;;  %1518 = vpow2.f32 %v780_v32  ;;  %v2007_v46 = vsel %vm493_vm1, 1.0, %v2389_v24 }
 0x173   : > { %v764_v47 = vmul.f32 %v748_v41, %v524_v33  ;;  %v478_v48 = vmul.f32 0.70710677, %v400_v42  ;;  %1520 = vpow2.f32 %v778_v35  ;;  %v2011_v50 = vsel %vm492_vm2, 1.0, %v2389_v24 }
 0x174   : > { %v1312_v49 = vpop.f32.mrb[8].mxu0  ;;  %v527_v51 = vand.u32 2147483647, %v479_v45  ;;  %v415_v52 = vadd.f32 %v1309_v34, %v1983_v0  ;;  %1522 = vrcp.f32 %v557_v36  ;;  %v784_v54 = vmul.f32 1.442695, %v765_v39 }
 0x175   : > { %v419_v53 = vpop.f32.mrb[9].mxu0  ;;  %v556_v55 = vadd.f32 1.0, %v540_v40  ;;  %v2014_v56 = vmul.f32 0.5, %v405_v37  ;;  %vm495_vm3 = vcmp.ge.f32.partialorder %v479_v45, 0.0  ;;  %v526_v59 = vand.u32 2147483647, %v478_v48 }
 0x176   : > { %v543_v57 = vmul.f32 0.3275911, %v527_v51  ;;  %v751_v58 = vsub.f32 0.0, %v527_v51  ;;  %v782_v60 = vmul.f32 1.442695, %v764_v47  ;;  %vm494_vm4 = vcmp.ge.f32.partialorder %v478_v48, 0.0 }
 0x177   : > { %v481_v61 = vmul.f32 0.70710677, %v415_v52  ;;  %v410_v62 = vadd.f32 %v1983_v0, %v409_v38  ;;  %v542_v3 = vmul.f32 0.3275911, %v526_v59  ;;  %v750_v4 = vsub.f32 0.0, %v526_v59 }
 0x178   : > { %v1315_v63 = vpop.f32.mrb[10].mxu0  ;;  %v559_v1 = vadd.f32 1.0, %v543_v57  ;;  %v767_v2 = vmul.f32 %v751_v58, %v527_v51  ;;  %1524 = vpow2.f32 %v784_v54  ;;  %v2017_v7 = vmul.f32 0.5, %v400_v42 }
 0x179   : > { %v429_v5 = vpop.f32.mrb[11].mxu0  ;;  %v529_v8 = vand.u32 2147483647, %v481_v61  ;;  %v480_v9 = vmul.f32 0.70710677, %v410_v62  ;;  %v2019_v10 = vpop.eup %1514  ;;  %1526 = vrcp.f32 %v556_v55  ;;  %v2023_v11 = vsel %vm495_vm3, 1.0, %v2389_v24 }
 0x17a   : > { %v2027_v12 = vsel %vm494_vm4, 1.0, %v2389_v24  ;;  %v766_v13 = vmul.f32 %v750_v4, %v526_v59  ;;  %1528 = vpow2.f32 %v782_v60  ;;  %v788_v14 = vmul.f32 1.442695, %v767_v2 }
 0x17b   : > { %v545_v15 = vmul.f32 0.3275911, %v529_v8  ;;  %v753_v16 = vsub.f32 0.0, %v529_v8  ;;  %v2031_v18 = vpop.eup %1516  ;;  %1530 = vrcp.f32 %v559_v1  ;;  %v558_v19 = vadd.f32 1.0, %v542_v3 }
 0x17c   : > { %v2029_v17 = vpop.f32.mrb[12].mxu0  ;;  %vm497_vm5 = vcmp.ge.f32.partialorder %v481_v61, 0.0  ;;  %v528_v20 = vand.u32 2147483647, %v480_v9  ;;  %v2035_v22 = vpop.eup %1518  ;;  %v786_v26 = vmul.f32 1.442695, %v766_v13  ;;  %v425_v29 = vadd.f32 %v1312_v49, %v1983_v0 }
 0x17d   : > { %v2033_v21 = vpop.f32.mrb[13].mxu0  ;;  %v561_v27 = vadd.f32 1.0, %v545_v15  ;;  %vm496_vm6 = vcmp.ge.f32.partialorder %v480_v9, 0.0  ;;  %v2038_v30 = vpop.eup %1520  ;;  %v769_v31 = vmul.f32 %v753_v16, %v529_v8  ;;  %v420_v34 = vadd.f32 %v1983_v0, %v419_v53 }
 0x17e   : > { %v544_v32 = vmul.f32 0.3275911, %v528_v20  ;;  %v752_v33 = vsub.f32 0.0, %v528_v20  ;;  %v2041_v35 = vpop.eup %1522  ;;  %1532 = vpow2.f32 %v788_v14  ;;  %v2043_v36 = vmul.f32 0.5, %v415_v52 }
 0x17f   : > { %v2045_v37 = vmul.f32 0.5, %v410_v62  ;;  %v483_v38 = vmul.f32 0.70710677, %v425_v29  ;;  %1534 = vrcp.f32 %v558_v19  ;;  %v2051_v40 = vsel %vm497_vm5, 1.0, %v2389_v24 }
 0x180   : > { %v2047_v39 = vpop.f32.mrb[14].mxu0  ;;  %v768_v41 = vmul.f32 %v752_v33, %v528_v20  ;;  %v482_v42 = vmul.f32 0.70710677, %v420_v34  ;;  %1536 = vpow2.f32 %v786_v26  ;;  %v2057_v47 = vsel %vm496_vm6, 1.0, %v2389_v24 }
 0x181   : > { %v2053_v45 = vpop.f32.mrb[15].mxu0  ;;  %v531_v48 = vand.u32 2147483647, %v483_v38  ;;  %v2060_v49 = vadd.f32 %v1315_v63, %v1983_v0  ;;  %1538 = vrcp.f32 %v561_v27  ;;  %v792_v51 = vmul.f32 1.442695, %v769_v31 }
 0x182   : > { %v560_v52 = vadd.f32 1.0, %v544_v32  ;;  %v2062_v53 = vmul.f32 0.5, %v425_v29  ;;  %v2064_v54 = vpop.eup %1524  ;;  %v2066_v58 = vmul.f32 0.5, %v420_v34  ;;  %v530_v59 = vand.u32 2147483647, %v482_v42 }
 0x183   : > { %2408 = vst [vmem:[#allocation12_spill] sm:$0xff] %v2060_v49  ;;  %v547_v55 = vmul.f32 0.3275911, %v531_v48  ;;  %v755_v57 = vsub.f32 0.0, %v531_v48  ;;  %v2068_v60 = vpop.eup %1526  ;;  %v790_v61 = vmul.f32 1.442695, %v768_v41  ;;  %v430_v63 = vadd.f32 %v1983_v0, %v429_v5 }
 0x184   : > { %2409 = vst [vmem:[#allocation13_spill] sm:$0xff] %v2062_v53  ;;  %2410 = vst [vmem:[#allocation14_spill] sm:$0xff] %v2066_v58  ;;  %vm499_vm7 = vcmp.ge.f32.partialorder %v483_v38, 0.0  ;;  %v485_v62 = vmul.f32 0.70710677, %v2060_v49  ;;  %v2072_v1 = vpop.eup %1528  ;;  %vm498_vm8 = vcmp.ge.f32.partialorder %v482_v42, 0.0  ;;  %1540 = vpow2.f32 %v792_v51 }
 0x185   : > { %v771_v2 = vmul.f32 %v755_v57, %v531_v48  ;;  %v546_v3 = vmul.f32 0.3275911, %v530_v59  ;;  %v754_v4 = vsub.f32 0.0, %v530_v59  ;;  %v2074_v8 = vpop.eup %1530  ;;  %v563_v9 = vadd.f32 1.0, %v547_v55 }
 0x186   : > { %v533_v13 = vand.u32 2147483647, %v485_v62  ;;  %v484_v14 = vmul.f32 0.70710677, %v430_v63  ;;  %1542 = vrcp.f32 %v560_v52  ;;  %v2077_v15 = vsel %vm499_vm7, 1.0, %v2389_v24 }
 0x187   : > { %2411 = vst [vmem:[#allocation15_spill] sm:$0xff] %v2077_v15  ;;  %v796_v16 = vmul.f32 1.442695, %v771_v2  ;;  %v770_v19 = vmul.f32 %v754_v4, %v530_v59  ;;  %v2080_v5 = vsel %vm498_vm8, 1.0, %v2389_v24  ;;  %v562_v20 = vadd.f32 1.0, %v546_v3 }
 0x188   : > { %2412 = vst [vmem:[#allocation16_spill] sm:$0xff] %v2080_v5  ;;  %v549_v26 = vmul.f32 0.3275911, %v533_v13  ;;  %v757_v27 = vsub.f32 0.0, %v533_v13  ;;  %v2082_v29 = vpop.eup %1532  ;;  %1544 = vpow2.f32 %v790_v61  ;;  %vm501_vm9 = vcmp.ge.f32.partialorder %v485_v62, 0.0 }
 0x189   : > { %v794_v31 = vmul.f32 1.442695, %v770_v19  ;;  %v532_v32 = vand.u32 2147483647, %v484_v14  ;;  %v2084_v33 = vpop.eup %1534  ;;  %1546 = vrcp.f32 %v563_v9  ;;  %v2088_v41 = vadd.f32 %v2029_v17, %v1983_v0 }
 0x18a   : > { %v565_v34 = vadd.f32 1.0, %v549_v26  ;;  %v773_v38 = vmul.f32 %v757_v27, %v533_v13  ;;  %v2090_v42 = vpop.eup %1536  ;;  %1548 = vpow2.f32 %v796_v16  ;;  %v2094_v52 = vadd.f32 %v1983_v0, %v2033_v21 }
 0x18b   : > { %2413 = vst [vmem:[#allocation17_spill] sm:$0xff] %v2088_v41  ;;  %v548_v48 = vmul.f32 0.3275911, %v532_v32  ;;  %v756_v51 = vsub.f32 0.0, %v532_v32  ;;  %v2096_v55 = vpop.eup %1538  ;;  %1550 = vrcp.f32 %v562_v20  ;;  %v2098_v59 = vmul.f32 0.5, %v430_v63 }
 0x18c   : > { %2414 = vst [vmem:[#allocation18_spill] sm:$0xff] %v2094_v52  ;;  %v800_v57 = vmul.f32 1.442695, %v773_v38  ;;  %v487_v61 = vmul.f32 0.70710677, %v2088_v41  ;;  %1552 = vpow2.f32 %v794_v31  ;;  %vm500_vm11 = vcmp.ge.f32.partialorder %v484_v14, 0.0 }
 0x18d   : > { %2415 = vst [vmem:[#allocation19_spill] sm:$0xff] %v2098_v59  ;;  %v564_v17 = vadd.f32 1.0, %v548_v48  ;;  %v772_v2 = vmul.f32 %v756_v51, %v532_v32  ;;  %v486_v3 = vmul.f32 0.70710677, %v2094_v52  ;;  %1554 = vrcp.f32 %v565_v34 }
 0x18e   : > { %v535_v4 = vand.u32 2147483647, %v487_v61  ;;  %v2105_v21 = vadd.f32 %v2047_v39, %v1983_v0  ;;  %v2109_v63 = vsel %vm501_vm9, 1.0, %v2389_v24  ;;  %1556 = vpow2.f32 %v800_v57  ;;  %v2111_v13 = vpop.eup %1540 }
 0x18f   : > { %2417 = vst [vmem:[#allocation21_spill] sm:$0xff] %v2109_v63  ;;  %v798_v9 = vmul.f32 1.442695, %v772_v2  ;;  %vm503_vm12 = vcmp.ge.f32.partialorder %v487_v61, 0.0  ;;  %vm502_vm13 = vcmp.ge.f32.partialorder %v486_v3, 0.0  ;;  %v2116_v14 = vsel %vm500_vm11, 1.0, %v2389_v24 }
 0x190   : > { %2416 = vst [vmem:[#allocation20_spill] sm:$0xff] %v2105_v21  ;;  %v551_v16 = vmul.f32 0.3275911, %v535_v4  ;;  %v759_v19 = vsub.f32 0.0, %v535_v4  ;;  %v534_v20 = vand.u32 2147483647, %v486_v3  ;;  %v2113_v26 = vpop.eup %1542  ;;  %1558 = vrcp.f32 %v564_v17 }
 0x191   : > { %2418 = vst [vmem:[#allocation22_spill] sm:$0xff] %v2116_v14  ;;  %v2119_v39 = vmul.f32 0.70710677, %v2105_v21  ;;  %v2123_v62 = vadd.f32 %v1983_v0, %v2053_v45  ;;  %v2129_v48 = vsel %vm503_vm12, 1.0, %v2389_v24  ;;  %v2132_v51 = vsel %vm502_vm13, 1.0, %v2389_v24 }
 0x192   : > { %v567_v27 = vadd.f32 1.0, %v551_v16  ;;  %v775_v31 = vmul.f32 %v759_v19, %v535_v4  ;;  %v550_v32 = vmul.f32 0.3275911, %v534_v20  ;;  %v758_v34 = vsub.f32 0.0, %v534_v20  ;;  %v2125_v38 = vpop.eup %1544  ;;  %2420 = vst [vmem:[#allocation24_spill] sm:$0xff] %v2129_v48  ;;  %2421 = vst [vmem:[#allocation25_spill] sm:$0xff] %v2132_v51 }
 0x193   : > { %2419 = vst [vmem:[#allocation23_spill] sm:$0xff] %v2123_v62  ;;  %v537_v57 = vand.u32 2147483647, %v2119_v39  ;;  %v488_v17 = vmul.f32 0.70710677, %v2123_v62  ;;  %v2136_v2 = vpop.eup %1546  ;;  %1560 = vpow2.f32 %v798_v9  ;;  %v2423_v21 = vmov -1.0  }
 0x194   : > { %v804_v0 = vmul.f32 1.442695, %v775_v31  ;;  %v566_v45 = vadd.f32 1.0, %v550_v32  ;;  %v774_v3 = vmul.f32 %v758_v34, %v534_v20  ;;  %v2138_v4 = vpop.eup %1548  ;;  %1562 = vrcp.f32 %v567_v27 }
 0x195   : > { %2422 = vst [vmem:[#allocation26_spill] sm:$0xff] %v2138_v4  ;;  %v553_v16 = vmul.f32 0.3275911, %v537_v57  ;;  %v761_v61 = vsub.f32 0.0, %v537_v57  ;;  %vm504_vm14 = vcmp.ge.f32.partialorder %v488_v17, 0.0  ;;  %v2140_v19 = vpop.eup %1550  ;;  %v2150_v20 = vsel %vm490_vm10, 1.0, %v2423_v21 }
 0x196   : > { %1564 = vpow2.f32 %v804_v0  ;;  %v802_v24 = vmul.f32 1.442695, %v774_v3  ;;  %v2143_v41 = vsel %vm504_vm14, 1.0, %v2423_v21  ;;  %v536_v62 = vand.u32 2147483647, %v488_v17  ;;  %v2145_v49 = vpop.eup %1552 }
 0x197   : > { %2424 = vst [vmem:[#allocation27_spill] sm:$0xff] %v2143_v41  ;;  %1566 = vrcp.f32 %v566_v45  ;;  %v569_v9 = vadd.f32 1.0, %v553_v16  ;;  %v777_v31 = vmul.f32 %v761_v61, %v537_v57  ;;  %v2152_v27 = vpop.eup %1554  ;;  %v602_v0 = vmul.f32 1.0614054, %v2031_v18 }
 0x198   : > { %1568 = vpow2.f32 %v802_v24  ;;  %v552_v32 = vmul.f32 0.3275911, %v536_v62  ;;  %v760_v34 = vsub.f32 0.0, %v536_v62  ;;  %v2155_v3 = vpop.eup %1556  ;;  %v603_v45 = vmul.f32 1.0614054, %v2019_v10 }
 0x199   : > { %2425 = vst [vmem:[#allocation28_spill] sm:$0xff] %v2155_v3  ;;  %1570 = vrcp.f32 %v569_v9  ;;  %v808_v17 = vmul.f32 1.442695, %v777_v31  ;;  %v604_v57 = vmul.f32 1.0614054, %v2068_v60  ;;  %vm505_vm15 = vcmp.ge.f32.partialorder %v2119_v39, 0.0 }
 0x19a   : > { %v568_v16 = vadd.f32 1.0, %v552_v32  ;;  %v776_v61 = vmul.f32 %v760_v34, %v536_v62  ;;  %v618_v6 = vadd.f32 -1.4531521, %v602_v0  ;;  %v605_v21 = vmul.f32 1.0614054, %v2041_v35  ;;  %v2160_v41 = vpop.eup %1558 }
 0x19b   : > { %1572 = vpow2.f32 %v808_v17  ;;  %v619_v24 = vadd.f32 -1.4531521, %v603_v45  ;;  %v620_v52 = vadd.f32 -1.4531521, %v604_v57  ;;  %v606_v48 = vmul.f32 1.0614054, %v2084_v33 }
 0x19c   : > { %1574 = vrcp.f32 %v568_v16  ;;  %v806_v59 = vmul.f32 1.442695, %v776_v61  ;;  %v634_v9 = vmul.f32 %v2031_v18, %v618_v6  ;;  %v621_v31 = vadd.f32 -1.4531521, %v605_v21 }
 0x19d   : > { %v635_v53 = vmul.f32 %v2019_v10, %v619_v24  ;;  %v636_v32 = vmul.f32 %v2068_v60, %v620_v52  ;;  %v622_v62 = vadd.f32 -1.4531521, %v606_v48  ;;  %v607_v34 = vmul.f32 1.0614054, %v2074_v8  ;;  %v2167_v0 = vpop.eup %1560 }
 0x19e   : > { %2426 = vst [vmem:[#allocation29_spill] sm:$0xff] %v2167_v0  ;;  %1576 = vpow2.f32 %v806_v59  ;;  %v650_v17 = vadd.f32 1.4214138, %v634_v9  ;;  %v637_v45 = vmul.f32 %v2041_v35, %v621_v31  ;;  %v608_v57 = vmul.f32 1.0614054, %v2113_v26  ;;  %v2171_v16 = vpop.eup %1562 }
 0x19f   : > { %v651_v61 = vadd.f32 1.4214138, %v635_v53  ;;  %v652_v6 = vadd.f32 1.4214138, %v636_v32  ;;  %v638_v21 = vmul.f32 %v2084_v33, %v622_v62  ;;  %v623_v24 = vadd.f32 -1.4531521, %v607_v34 }
 0x1a0   : > { %v2174_v58 = vpop.eup %1564  ;;  %v666_v52 = vmul.f32 %v2031_v18, %v650_v17  ;;  %v653_v48 = vadd.f32 1.4214138, %v637_v45  ;;  %v624_v51 = vadd.f32 -1.4531521, %v608_v57  ;;  %v609_v59 = vmul.f32 1.0614054, %v2096_v55 }
 0x1a1   : > { %2427 = vst [vmem:[#allocation30_spill] sm:$0xff] %v2174_v58  ;;  %v2178_v9 = vpop.eup %1566  ;;  %v667_v31 = vmul.f32 %v2019_v10, %v651_v61  ;;  %v668_v63 = vmul.f32 %v2068_v60, %v652_v6  ;;  %v654_v14 = vadd.f32 1.4214138, %v638_v21  ;;  %v639_v53 = vmul.f32 %v2074_v8, %v623_v24 }
 0x1a2   : > { %v2183_v32 = vpop.eup %1568  ;;  %v682_v62 = vadd.f32 -0.28449672, %v666_v52  ;;  %v669_v34 = vmul.f32 %v2041_v35, %v653_v48  ;;  %v640_v17 = vmul.f32 %v2113_v26, %v624_v51  ;;  %v625_v45 = vadd.f32 -1.4531521, %v609_v59 }
 0x1a3   : > { %2428 = vst [vmem:[#allocation31_spill] sm:$0xff] %v2183_v32  ;;  %v2187_v57 = vpop.eup %1570  ;;  %v683_v58 = vadd.f32 -0.28449672, %v667_v31  ;;  %v684_v15 = vadd.f32 -0.28449672, %v668_v63  ;;  %v670_v5 = vmul.f32 %v2084_v33, %v654_v14 }
 0x1a4   : > { %v655_v61 = vadd.f32 1.4214138, %v639_v53  ;;  %v698_v6 = vmul.f32 %v2031_v18, %v682_v62  ;;  %v685_v21 = vadd.f32 -0.28449672, %v669_v34  ;;  %v656_v3 = vadd.f32 1.4214138, %v640_v17 }
 0x1a5   : > { %v641_v24 = vmul.f32 %v2096_v55, %v625_v45  ;;  %v2192_v32 = vpop.eup %1572  ;;  %v699_v52 = vmul.f32 %v2019_v10, %v683_v58  ;;  %v700_v51 = vmul.f32 %v2068_v60, %v684_v15  ;;  %v686_v48 = vadd.f32 -0.28449672, %v670_v5 }
 0x1a6   : > { %2429 = vst [vmem:[#allocation32_spill] sm:$0xff] %v2192_v32  ;;  %v671_v59 = vmul.f32 %v2074_v8, %v655_v61  ;;  %v2197_v31 = vpop.eup %1574  ;;  %v714_v63 = vadd.f32 0.2548296, %v698_v6  ;;  %v701_v14 = vmul.f32 %v2041_v35, %v685_v21  ;;  %v672_v53 = vmul.f32 %v2113_v26, %v656_v3 }
 0x1a7   : > { %v657_v62 = vadd.f32 1.4214138, %v641_v24  ;;  %v715_v34 = vadd.f32 0.2548296, %v699_v52  ;;  %v716_v17 = vadd.f32 0.2548296, %v700_v51  ;;  %v702_v45 = vmul.f32 %v2084_v33, %v686_v48 }
 0x1a8   : > { %v687_v32 = vadd.f32 -0.28449672, %v671_v59  ;;  %v2202_v0 = vpop.eup %1576  ;;  %v730_v58 = vmul.f32 %v2031_v18, %v714_v63  ;;  %v717_v15 = vadd.f32 0.2548296, %v701_v14  ;;  %v688_v5 = vadd.f32 -0.28449672, %v672_v53 }
 0x1a9   : > { %v673_v61 = vmul.f32 %v2096_v55, %v657_v62  ;;  %v731_v6 = vmul.f32 %v2019_v10, %v715_v34  ;;  %v732_v21 = vmul.f32 %v2068_v60, %v716_v17  ;;  %v718_v4 = vadd.f32 0.2548296, %v702_v45 }
 0x1aa   : > { %v703_v3 = vmul.f32 %v2074_v8, %v687_v32  ;;  %v810_v24 = vmul.f32 %v2038_v30, %v730_v58  ;;  %v733_v52 = vmul.f32 %v2041_v35, %v717_v15  ;;  %v704_v51 = vmul.f32 %v2113_v26, %v688_v5 }
 0x1ab   : > { %v689_v48 = vadd.f32 -0.28449672, %v673_v61  ;;  %v811_v18 = vmul.f32 %v2035_v22, %v731_v6  ;;  %v812_v59 = vmul.f32 %v2072_v1, %v732_v21  ;;  %v734_v63 = vmul.f32 %v2084_v33, %v718_v4 }
 0x1ac   : > { %v719_v14 = vadd.f32 0.2548296, %v703_v3  ;;  %v826_v10 = vsub.f32 1.0, %v810_v24  ;;  %v813_v60 = vmul.f32 %v2064_v54, %v733_v52  ;;  %v720_v53 = vadd.f32 0.2548296, %v704_v51 }
 0x1ad   : > { %v705_v32 = vmul.f32 %v2096_v55, %v689_v48  ;;  %v827_v62 = vsub.f32 1.0, %v811_v18  ;;  %v828_v30 = vsub.f32 1.0, %v812_v59  ;;  %v814_v35 = vmul.f32 %v2090_v42, %v734_v63 }
 0x1ae   : > { %v735_v34 = vmul.f32 %v2074_v8, %v719_v14  ;;  %v842_v17 = vmul.f32 %v826_v10, %v2150_v20  ;;  %v829_v22 = vsub.f32 1.0, %v813_v60  ;;  %v736_v1 = vmul.f32 %v2113_v26, %v720_v53 }
 0x1af   : > { %v721_v45 = vadd.f32 0.2548296, %v705_v32  ;;  %v843_v33 = vmul.f32 %v827_v62, %v1995_v25  ;;  %v844_v4 = vmul.f32 %v828_v30, %v2011_v50  ;;  %v830_v54 = vsub.f32 1.0, %v814_v35 }
 0x1b0   : > { %v815_v58 = vmul.f32 %v2082_v29, %v735_v34  ;;  %v858_v15 = vadd.f32 1.0, %v842_v17  ;;  %v845_v5 = vmul.f32 %v829_v22, %v2007_v46  ;;  %v816_v42 = vmul.f32 %v2125_v38, %v736_v1 }
 0x1b1   : > { %v737_v8 = vmul.f32 %v2096_v55, %v721_v45  ;;  %v859_v61 = vadd.f32 1.0, %v843_v33  ;;  %v860_v20 = vadd.f32 1.0, %v844_v4  ;;  %v846_v6 = vmul.f32 %v830_v54, %v2027_v12 }
 0x1b2   : > { %v831_v26 = vsub.f32 1.0, %v815_v58  ;;  %v874_v21 = vmul.f32 %v858_v15, %v1997_v28  ;;  %v861_v25 = vadd.f32 1.0, %v845_v5  ;;  %v832_v3 = vsub.f32 1.0, %v816_v42 }
 0x1b3   : > { %v817_v50 = vmul.f32 %v2111_v13, %v737_v8  ;;  %v875_v29 = vmul.f32 %v859_v61, %v1992_v23  ;;  %v876_v24 = vmul.f32 %v860_v20, %v2003_v44  ;;  %v862_v46 = vadd.f32 1.0, %v846_v6 }
 0x1b4   : > { %v847_v38 = vmul.f32 %v831_v26, %v2023_v11  ;;  %1354 = vmatprep.mubr.f32.mxu1 %v874_v21  ;;  %v877_v55 = vmul.f32 %v861_v25, %v2001_v43  ;;  %v848_v52 = vmul.f32 %v832_v3, %v2057_v47  ;;  %v610_v51 = vmul.f32 1.0614054, %v2140_v19 }
 0x1b5   : > { %v833_v12 = vsub.f32 1.0, %v817_v50  ;;  %1355 = vmatmul.mubr.f32.vlgmr.msra.gmra.mrb[0].mxu1 %v875_v29  ;;  %v878_v28 = vmul.f32 %v862_v46, %v2017_v7  ;;  %v611_v13 = vmul.f32 1.0614054, %v2136_v2  ;;  %v612_v23 = vmul.f32 1.0614054, %v2160_v41 }
 0x1b6   : > { %v863_v48 = vadd.f32 1.0, %v847_v38  ;;  %1357 = vmatprep.mubr.f32.mxu1 %v876_v24  ;;  %v864_v44 = vadd.f32 1.0, %v848_v52  ;;  %v626_v18 = vadd.f32 -1.4531521, %v610_v51  ;;  %v613_v43 = vmul.f32 1.0614054, %v2152_v27 }
 0x1b7   : > { %v849_v11 = vmul.f32 %v833_v12, %v2051_v40  ;;  %v627_v59 = vadd.f32 -1.4531521, %v611_v13  ;;  %v628_v63 = vadd.f32 -1.4531521, %v612_v23  ;;  %v614_v14 = vmul.f32 1.0614054, %v2178_v9 }
 0x1b8   : > { %v879_v47 = vmul.f32 %v863_v48, %v2014_v56  ;;  %v880_v7 = vmul.f32 %v864_v44, %v2045_v37  ;;  %v642_v60 = vmul.f32 %v2140_v19, %v626_v18  ;;  %v629_v53 = vadd.f32 -1.4531521, %v613_v43 }
 0x1b9   : > { %v865_v10 = vadd.f32 1.0, %v849_v11  ;;  %1358 = vmatmul.mubr.f32.gmra.mrb[2].mxu1 %v877_v55  ;;  %v643_v32 = vmul.f32 %v2136_v2, %v627_v59  ;;  %v644_v40 = vmul.f32 %v2160_v41, %v628_v63  ;;  %v630_v62 = vadd.f32 -1.4531521, %v614_v14 }
 0x1ba   : > { %v615_v30 = vmul.f32 1.0614054, %v2171_v16  ;;  %1360 = vmatprep.mubr.f32.mxu1 %v878_v28  ;;  %v658_v35 = vadd.f32 1.4214138, %v642_v60  ;;  %v645_v34 = vmul.f32 %v2152_v27, %v629_v53  ;;  %v616_v37 = vmul.f32 1.0614054, %v2197_v31 }
 0x1bb   : > { %v881_v56 = vmul.f32 %v865_v10, %v2043_v36  ;;  %v659_v17 = vadd.f32 1.4214138, %v643_v32  ;;  %v660_v22 = vadd.f32 1.4214138, %v644_v40  ;;  %v646_v1 = vmul.f32 %v2178_v9, %v630_v62 }
 0x1bc   : > { %v631_v45 = vadd.f32 -1.4531521, %v615_v30  ;;  %v674_v33 = vmul.f32 %v2140_v19, %v658_v35  ;;  %v661_v4 = vadd.f32 1.4214138, %v645_v34  ;;  %v632_v54 = vadd.f32 -1.4531521, %v616_v37 }
 0x1bd   : > { %v617_v58 = vmul.f32 1.0614054, %v2187_v57  ;;  %1361 = vmatmul.mubr.f32.gmra.mrb[4].mxu1 %v879_v47  ;;  %v675_v15 = vmul.f32 %v2136_v2, %v659_v17  ;;  %v676_v36 = vmul.f32 %v2160_v41, %v660_v22  ;;  %v662_v5 = vadd.f32 1.4214138, %v646_v1  ;;  %v2432_v37 = vld [vmem:[#allocation28_spill] sm:$0xff] }
 0x1be   : > { %v647_v42 = vmul.f32 %v2171_v16, %v631_v45  ;;  %1363 = vmatprep.mubr.f32.mxu1 %v880_v7  ;;  %v690_v8 = vadd.f32 -0.28449672, %v674_v33  ;;  %v677_v61 = vmul.f32 %v2152_v27, %v661_v4  ;;  %v648_v20 = vmul.f32 %v2197_v31, %v632_v54  ;;  %v2433_v45 = vld [vmem:[#allocation31_spill] sm:$0xff]  ;;  %v2434_v54 = vld [vmem:[#allocation16_spill] sm:$0xff] }
 0x1bf   : > { %v633_v6 = vadd.f32 -1.4531521, %v617_v58  ;;  %v691_v26 = vadd.f32 -0.28449672, %v675_v15  ;;  %v692_v21 = vadd.f32 -0.28449672, %v676_v36  ;;  %v678_v25 = vmul.f32 %v2178_v9, %v662_v5 }
 0x1c0   : > { %v663_v3 = vadd.f32 1.4214138, %v647_v42  ;;  %v706_v50 = vmul.f32 %v2140_v19, %v690_v8  ;;  %v693_v29 = vadd.f32 -0.28449672, %v677_v61  ;;  %v664_v24 = vadd.f32 1.4214138, %v648_v20 }
 0x1c1   : > { %v649_v46 = vmul.f32 %v2187_v57, %v633_v6  ;;  %1364 = vmatmul.mubr.f32.gmra.mrb[6].mxu1 %v881_v56  ;;  %v707_v38 = vmul.f32 %v2136_v2, %v691_v26  ;;  %v708_v55 = vmul.f32 %v2160_v41, %v692_v21  ;;  %v694_v52 = vadd.f32 -0.28449672, %v678_v25  ;;  %v2431_v56 = vld [vmem:[#allocation29_spill] sm:$0xff]  ;;  %v2436_v8 = vld [vmem:[#allocation22_spill] sm:$0xff] }
 0x1c2   : > { %v679_v12 = vmul.f32 %v2171_v16, %v663_v3  ;;  %v722_v51 = vadd.f32 0.2548296, %v706_v50  ;;  %v709_v28 = vmul.f32 %v2152_v27, %v693_v29  ;;  %v680_v48 = vmul.f32 %v2197_v31, %v664_v24  ;;  %v2437_v6 = vld [vmem:[#allocation30_spill] sm:$0xff]  ;;  %v2438_v25 = vld [vmem:[#allocation21_spill] sm:$0xff] }
 0x1c3   : > { %v665_v13 = vadd.f32 1.4214138, %v649_v46  ;;  %v723_v23 = vadd.f32 0.2548296, %v707_v38  ;;  %v724_v44 = vadd.f32 0.2548296, %v708_v55  ;;  %v710_v11 = vmul.f32 %v2178_v9, %v694_v52 }
 0x1c4   : > { %v695_v18 = vadd.f32 -0.28449672, %v679_v12  ;;  %v738_v43 = vmul.f32 %v2140_v19, %v722_v51  ;;  %v725_v47 = vadd.f32 0.2548296, %v709_v28  ;;  %v696_v59 = vadd.f32 -0.28449672, %v680_v48 }
 0x1c5   : > { %v681_v63 = vmul.f32 %v2187_v57, %v665_v13  ;;  %v739_v14 = vmul.f32 %v2136_v2, %v723_v23  ;;  %v740_v7 = vmul.f32 %v2160_v41, %v724_v44  ;;  %v726_v10 = vadd.f32 0.2548296, %v710_v11  ;;  %v2430_v19 = vld [vmem:[#allocation26_spill] sm:$0xff]  ;;  %v2439_v46 = vld [vmem:[#allocation25_spill] sm:$0xff]  ;;  %v2441_v28 = vld [vmem:[#allocation32_spill] sm:$0xff] }
 0x1c6   : > { %v711_v60 = vmul.f32 %v2171_v16, %v695_v18  ;;  %v818_v53 = vmul.f32 %v2145_v49, %v738_v43  ;;  %v741_v32 = vmul.f32 %v2152_v27, %v725_v47  ;;  %v712_v40 = vmul.f32 %v2197_v31, %v696_v59  ;;  %v2440_v55 = vld [vmem:[#allocation14_spill] sm:$0xff]  ;;  %v2442_v13 = vld [vmem:[#allocation13_spill] sm:$0xff]  ;;  %v2443_v44 = vld [vmem:[#allocation19_spill] sm:$0xff] }
 0x1c7   : > { %v697_v62 = vadd.f32 -0.28449672, %v681_v63  ;;  %v819_v30 = vmul.f32 %v2430_v19, %v739_v14  ;;  %v820_v35 = vmul.f32 %v2431_v56, %v740_v7  ;;  %v742_v2 = vmul.f32 %v2178_v9, %v726_v10  ;;  %v2435_v9 = vld [vmem:[#allocation15_spill] sm:$0xff]  ;;  %v2444_v43 = vld [vmem:[#allocation24_spill] sm:$0xff]  ;;  %v2445_v47 = vld [vmem:[#allocation18_spill] sm:$0xff] }
 0x1c8   : > { %v727_v34 = vadd.f32 0.2548296, %v711_v60  ;;  %v834_v41 = vsub.f32 1.0, %v818_v53  ;;  %v821_v17 = vmul.f32 %v2432_v37, %v741_v32  ;;  %v728_v22 = vadd.f32 0.2548296, %v712_v40  ;;  %v2446_v59 = vld [vmem:[#allocation27_spill] sm:$0xff] }
 0x1c9   : > { %v713_v49 = vmul.f32 %v2187_v57, %v697_v62  ;;  %v835_v1 = vsub.f32 1.0, %v819_v30  ;;  %v836_v27 = vsub.f32 1.0, %v820_v35  ;;  %v822_v33 = vmul.f32 %v2433_v45, %v742_v2  ;;  %v2447_v7 = vld [vmem:[#allocation12_spill] sm:$0xff]  ;;  %v2449_v56 = vld [vmem:[#allocation23_spill] sm:$0xff]  ;;  %v2450_v2 = vld [vmem:[#allocation17_spill] sm:$0xff] }
 0x1ca   : > { %v743_v4 = vmul.f32 %v2171_v16, %v727_v34  ;;  %v850_v58 = vmul.f32 %v834_v41, %v2434_v54  ;;  %v837_v15 = vsub.f32 1.0, %v821_v17  ;;  %v744_v36 = vmul.f32 %v2197_v31, %v728_v22  ;;  %v2451_v22 = vld [vmem:[#allocation20_spill] sm:$0xff] }
 0x1cb   : > { %v729_v5 = vadd.f32 0.2548296, %v713_v49  ;;  %v851_v42 = vmul.f32 %v835_v1, %v2435_v9  ;;  %v852_v61 = vmul.f32 %v836_v27, %v2436_v8  ;;  %v838_v20 = vsub.f32 1.0, %v822_v33  ;;  %v1194_v1 = vld [vmem:[%s2384_s4] ss:$0 sm:$0xff] }
 0x1cc   : > { %v823_v26 = vmul.f32 %v2437_v6, %v743_v4  ;;  %v866_v21 = vadd.f32 1.0, %v850_v58  ;;  %v853_v3 = vmul.f32 %v837_v15, %v2438_v25  ;;  %v824_v50 = vmul.f32 %v2202_v0, %v744_v36 }
 0x1cd   : > { %v745_v16 = vmul.f32 %v2187_v57, %v729_v5  ;;  %v867_v29 = vadd.f32 1.0, %v851_v42  ;;  %v868_v24 = vadd.f32 1.0, %v852_v61  ;;  %v854_v38 = vmul.f32 %v838_v20, %v2439_v46 }
 0x1ce   : > { %v839_v31 = vsub.f32 1.0, %v823_v26  ;;  %v882_v52 = vmul.f32 %v866_v21, %v2440_v55  ;;  %v869_v12 = vadd.f32 1.0, %v853_v3  ;;  %v840_v51 = vsub.f32 1.0, %v824_v50 }
 0x1cf   : > { %v825_v48 = vmul.f32 %v2441_v28, %v745_v16  ;;  %v883_v23 = vmul.f32 %v867_v29, %v2442_v13  ;;  %v884_v11 = vmul.f32 %v868_v24, %v2443_v44  ;;  %v870_v18 = vadd.f32 1.0, %v854_v38 }
 0x1d0   : > { %v855_v0 = vmul.f32 %v839_v31, %v2444_v43  ;;  %v470_v57 = vmul.f32 0.5, %v2445_v47  ;;  %1366 = vmatprep.mubr.f32.mxu1 %v882_v52  ;;  %v856_v63 = vmul.f32 %v840_v51, %v2446_v59  ;;  %v469_v10 = vmul.f32 0.5, %v2447_v7 }
 0x1d1   : > { %v841_v14 = vsub.f32 1.0, %v825_v48  ;;  %1367 = vmatmul.mubr.f32.gmra.mrb[8].mxu1 %v883_v23  ;;  %v2448_v60 = vmov -1.0   ;;  %v472_v35 = vmul.f32 0.5, %v2449_v56  ;;  %v471_v34 = vmul.f32 0.5, %v2450_v2 }
 0x1d2   : > { %v521_v53 = vsel %vm505_vm15, 1.0, %v2448_v60  ;;  %1369 = vmatprep.mubr.f32.mxu1 %v884_v11  ;;  %v886_v32 = vmul.f32 %v870_v18, %v470_v57  ;;  %v872_v40 = vadd.f32 1.0, %v856_v63  ;;  %v885_v62 = vmul.f32 %v869_v12, %v469_v10 }
 0x1d3   : > { %v871_v19 = vadd.f32 1.0, %v855_v0  ;;  %v857_v30 = vmul.f32 %v841_v14, %v521_v53  ;;  %v473_v49 = vmul.f32 0.5, %v2451_v22 }
 0x1d4   : > { %v888_v41 = vmul.f32 %v872_v40, %v472_v35 }
 0x1d5   : > { %1370 = vmatmul.mubr.f32.gmra.mrb[10].mxu1 %v885_v62  ;;  %v887_v37 = vmul.f32 %v871_v19, %v471_v34  ;;  %v873_v17 = vadd.f32 1.0, %v857_v30 }
 0x1d6   : > { %1372 = vmatprep.mubr.f32.mxu1 %v886_v32 }
 0x1d7   : > { %v889_v39 = vmul.f32 %v873_v17, %v473_v49 }
 0x1d9   : > { %1373 = vmatmul.mubr.f32.gmra.mrb[12].mxu1 %v887_v37 }
 0x1da   : > { %1375 = vmatprep.mubr.f32.mxu1 %v888_v41 }
 0x1dd   : > { %1376 = vmatmul.mubr.f32.gmra.mrb[14].mxu1 %v889_v39 }
 0x288   : > { %v1356_v27 = vpop.f32.mrb[0].mxu1 }
 0x289   : > { %v985_v45 = vadd.f32 %v1356_v27, %v1194_v1  ;;  %v979_v33 = vpop.f32.mrb[1].mxu1 }
 0x28a   : > { %v980_v4 = vadd.f32 %v1194_v1, %v979_v33 }
 0x28b   : > { %1059 = vst [vmem:[%s2312_s10 + $0x8] sm:$0xff] %v985_v45 }
 0x28c   : > { %1058 = vst [vmem:[%s2312_s10] sm:$0xff] %v980_v4  ;;  %v1359_v54 = vpop.f32.mrb[2].mxu1 }
 0x28d   : > { %v995_v58 = vadd.f32 %v1359_v54, %v1194_v1  ;;  %v989_v15 = vpop.f32.mrb[3].mxu1 }
 0x28e   : > { %v990_v36 = vadd.f32 %v1194_v1, %v989_v15 }
 0x28f   : > { %1061 = vst [vmem:[%s2312_s10 + $0x18] sm:$0xff] %v995_v58 }
 0x290   : > { %1060 = vst [vmem:[%s2312_s10 + $0x10] sm:$0xff] %v990_v36  ;;  %v1362_v5 = vpop.f32.mrb[4].mxu1 }
 0x291   : > { %v1005_v9 = vadd.f32 %v1362_v5, %v1194_v1  ;;  %v999_v42 = vpop.f32.mrb[5].mxu1 }
 0x292   : > { %v1000_v8 = vadd.f32 %v1194_v1, %v999_v42 }
 0x293   : > { %1063 = vst [vmem:[%s2312_s10 + $0x28] sm:$0xff] %v1005_v9 }
 0x294   : > { %1062 = vst [vmem:[%s2312_s10 + $0x20] sm:$0xff] %v1000_v8  ;;  %v1365_v61 = vpop.f32.mrb[6].mxu1 }
 0x295   : > { %v1015_v20 = vadd.f32 %v1365_v61, %v1194_v1  ;;  %v1009_v6 = vpop.f32.mrb[7].mxu1 }
 0x296   : > { %v1010_v26 = vadd.f32 %v1194_v1, %v1009_v6 }
 0x297   : > { %1065 = vst [vmem:[%s2312_s10 + $0x38] sm:$0xff] %v1015_v20 }
 0x298   : > { %1064 = vst [vmem:[%s2312_s10 + $0x30] sm:$0xff] %v1010_v26 }
 0x2a4   : > { %v1368_v21 = vpop.f32.mrb[8].mxu1 }
 0x2a5   : > { %v1025_v25 = vadd.f32 %v1368_v21, %v1194_v1  ;;  %v1019_v3 = vpop.f32.mrb[9].mxu1 }
 0x2a6   : > { %v1020_v50 = vadd.f32 %v1194_v1, %v1019_v3 }
 0x2a7   : > { %1067 = vst [vmem:[%s2312_s10 + $0x48] sm:$0xff] %v1025_v25 }
 0x2a8   : > { %1066 = vst [vmem:[%s2312_s10 + $0x40] sm:$0xff] %v1020_v50  ;;  %v1371_v16 = vpop.f32.mrb[10].mxu1 }
 0x2a9   : > { %v1035_v29 = vadd.f32 %v1371_v16, %v1194_v1  ;;  %v1029_v24 = vpop.f32.mrb[11].mxu1 }
 0x2aa   : > { %v1030_v46 = vadd.f32 %v1194_v1, %v1029_v24 }
 0x2ab   : > { %1069 = vst [vmem:[%s2312_s10 + $0x58] sm:$0xff] %v1035_v29 }
 0x2ac   : > { %1068 = vst [vmem:[%s2312_s10 + $0x50] sm:$0xff] %v1030_v46  ;;  %v1374_v38 = vpop.f32.mrb[12].mxu1 }
 0x2ad   : > { %v1045_v31 = vadd.f32 %v1374_v38, %v1194_v1  ;;  %v1039_v55 = vpop.f32.mrb[13].mxu1 }
 0x2ae   : > { %v1040_v52 = vadd.f32 %v1194_v1, %v1039_v55 }
 0x2af   : > { %1071 = vst [vmem:[%s2312_s10 + $0x68] sm:$0xff] %v1045_v31 }
 0x2b0   : > { %1070 = vst [vmem:[%s2312_s10 + $0x60] sm:$0xff] %v1040_v52  ;;  %v1377_v12 = vpop.f32.mrb[14].mxu1 }
 0x2b1   : > { %v1055_v51 = vadd.f32 %v1377_v12, %v1194_v1  ;;  %v1049_v28 = vpop.f32.mrb[15].mxu1 }
 0x2b2   : > { %v1050_v48 = vadd.f32 %v1194_v1, %v1049_v28 }
 0x2b3   : > { %1073 = vst [vmem:[%s2312_s10 + $0x78] sm:$0xff] %v1055_v51 }
 0x2b4   : > { %1072 = vst [vmem:[%s2312_s10 + $0x70] sm:$0xff] %v1050_v48 }
 0x2b5   : > { %1677 = shalt.err (!%p1674_p7)
}
 0x2b6   : > { %s1678_s12 = scalar_lea.hbm %s2333_s11, 2048  ;;  %s1682_s15 = scalar_lea.hbm %s2385_s5, 6144 }
 0x2b7   : > { %p1679_p9 = scmp.ne.s32.totalorder %s2333_s11, %s1678_s12  ;;  %p1683_p5 = scmp.lt.u32.totalorder %s2333_s11, %s2385_s5 }
 0x2b8   : > { %p1684_p10 = scmp.lt.u32.totalorder %s1682_s15, %s1678_s12  ;;  %p1686_p2 = scmp.lt.u32.totalorder %s1678_s12, %s2333_s11 }
 0x2b9   : > { %p1680_p12 = pnand %p1679_p9, %p1893_p6 }
 0x2ba   : > { %p1685_p1 = por %p1684_p10, %p1683_p5 }
 0x2bb   : > { %p1681_p0 = pneg %p1680_p12 }
 0x2bc   : > { %p1687_p4 = por %p1686_p2, %p1685_p1 }
 0x2be   : > { %p1688_p8 = pnand %p1687_p4, %p1681_p0 }
 0x2c0   : > { %1691 = shalt.err (!%p1688_p8)
}
 0x2c1   : > { %s1743_s28 = smov 128   ;;  %s1744_s9 = smov 8  }
 0x2c2   : > { %1452 = dma.vmem_to_hbm [thread:$0]  (%p1893_p6), %s2335_s13, 2048, %s2333_s11, %s1075_s22, %s1743_s28, %s1743_s28, %s1744_s9  }
 0x2c3 PF: > { %p1474_p11 = scmp.ge.s32.totalorder %s1734_s21, 2  ;;  %s1103_s30 = sand.u32 1, %s1722_s18  }
 0x2c4   : > { %p2452_p13 = scmp.ne.s32.totalorder %s2398_s25, 0  ;;  %s1104_s17 = scalar_lea.sflag [#allocation4], %s1103_s30 }
 0x2c6   : > { %p1466_p3 = pnand %p1474_p11, %p2452_p13 }
 0x2c8   : > { %1717 = dma.done.wait (!%p1466_p3), %s1104_s17, 2048  }
 0x2c9   : > { %1719 = vsyncadd (!%p1466_p3), %s1104_s17, 4294965248  ;;  %p19_p7 = scmp.ge.s32.totalorder %s1883_s29, 5   ;;  %s2453_s18 = smov %s1726_s19 }
 0x2ca   : > { %s2454_s19 = smov %s1730_s20  ;;  %s2455_s20 = smov %s1899_s27 }
 0x2cb   : > { %s2456_s21 = smov %s1883_s29  ;;  %21 = sbr.rel (!%p19_p7) target bundleno = 6 (0x6), region = 93 }
 0x2d2   :  { %1109 = vsyncpa [#allocation3], 1 }
 0x2d3   :  { %1111 = vsyncpa [#allocation3 + $0x1], 1 }
 0x2d4   :  { %1112 = vsyncpa [#allocation6], 1 }
 0x2d5   :  { %1113 = vsyncpa [#allocation4], 1 }
 0x2d6   :  { %1115 = vsyncpa [#allocation4 + $0x1], 1 }

</bundles_post_ra>
